<compile_context>
chip_gen: v5e
topology: v5e:2x2
jax: 0.10.0
libtpu: 0.0.40
codegen_flags: <defaults>
</compile_context>

<pallas_src>
import functools

import jax
import jax.numpy as jnp
import numpy as np
from jax.experimental import pallas as pl
from jax.experimental.pallas import tpu as pltpu


# --------------------------------------------------------------------------
# helpers
# --------------------------------------------------------------------------
def _round_up(x, m):
    return ((x + m - 1) // m) * m


def _pick_batch_tile(B, LQ, LS, Dp, bytes_budget=4 << 20):
    """Batch tile TB: multiple of 8 (sublane alignment), sized so the per-step
    working set (bf16 inputs + f32 masks + f32 scores) stays small enough that
    double-buffering fits comfortably under the scoped VMEM limit."""
    per_elem = (LQ + LS) * Dp * 2        # bf16 q/s embedding rows
    per_elem += (LQ + LS) * 4            # f32 masks
    per_elem += LQ * LS * 4              # f32 scores intermediate
    per_elem += 4                        # f32 output
    tb = max(1, bytes_budget // per_elem)
    tb = max(8, (tb // 8) * 8)           # multiple of 8, at least 8
    tb = min(tb, 256)                    # keep the scores tile bounded
    tb = min(tb, _round_up(B, 8))
    return int(tb)


# --------------------------------------------------------------------------
# Pallas kernel: batched  min_q max_s ( Q @ S^T )  -> sigmoid
# --------------------------------------------------------------------------
def _relevance_kernel(q_ref, s_ref, qmask_ref, smask_ref, out_ref):
    # q_ref:     (TB, LQ, Dp) bf16
    # s_ref:     (TB, LS, Dp) bf16
    # qmask_ref: (TB, LQ) f32 additive (+1e30 on padded query rows)
    # smask_ref: (TB, LS) f32 additive (-1e30 on padded src columns)
    # out_ref:   (TB, 1)  f32

    # Batched MXU matmul, f32 accumulation.
    scores = jnp.einsum(
        "bqd,bkd->bqk", q_ref[...], s_ref[...],
        preferred_element_type=jnp.float32,
    )                                               # (TB, LQ, LS) f32

    # Mask padded source columns, max over src axis (lane reduce / XLU).
    scores = scores + smask_ref[...][:, None, :]
    row_max = jnp.max(scores, axis=2)               # (TB, LQ)

    # Mask padded query rows, min over query axis.
    row_max = row_max + qmask_ref[...]
    m = jnp.min(row_max, axis=1, keepdims=True)     # (TB, 1)

    # Single sigmoid per batch element (sigmoid is monotone, so
    # sigmoid(min(...)) == min(sigmoid(...)) of the reference).
    out_ref[...] = 1.0 / (1.0 + jnp.exp(-m))


def _relevance_pallas(q_emb, s_emb, qmask, smask, tb):
    Bp, LQ, Dp = q_emb.shape
    _, LS, _ = s_emb.shape
    assert Bp % tb == 0

    return pl.pallas_call(
        _relevance_kernel,
        out_shape=jax.ShapeDtypeStruct((Bp, 1), jnp.float32),
        grid_spec=pltpu.PrefetchScalarGridSpec(
            num_scalar_prefetch=0,
            grid=(Bp // tb,),
            in_specs=[
                pl.BlockSpec((tb, LQ, Dp), lambda i: (i, 0, 0)),
                pl.BlockSpec((tb, LS, Dp), lambda i: (i, 0, 0)),
                pl.BlockSpec((tb, LQ), lambda i: (i, 0)),
                pl.BlockSpec((tb, LS), lambda i: (i, 0)),
            ],
            out_specs=pl.BlockSpec((tb, 1), lambda i: (i, 0)),
        ),
        compiler_params=pltpu.CompilerParams(
            # per-step output block -> batch axis is truly independent;
            # on v7x the two TensorCores split the grid.
            dimension_semantics=("parallel",),
            vmem_limit_bytes=32 * 1024 * 1024,
        ),
    )(q_emb, s_emb, qmask, smask)


# --------------------------------------------------------------------------
# jitted glue: embedding gather + mask build + kernel call
# --------------------------------------------------------------------------
@jax.jit
def _relevance_from_ids(en_tab, src_tab, q_ids, s_ids, q_lens, s_lens):
    B, LQ = q_ids.shape
    _, LS = s_ids.shape
    Dp = en_tab.shape[1]

    tb = _pick_batch_tile(B, LQ, LS, Dp)
    Bp = _round_up(B, tb)
    pad_b = Bp - B
    if pad_b:
        q_ids = jnp.pad(q_ids, ((0, pad_b), (0, 0)))
        s_ids = jnp.pad(s_ids, ((0, pad_b), (0, 0)))
        q_lens = jnp.pad(q_lens, (0, pad_b))
        s_lens = jnp.pad(s_lens, (0, pad_b))

    # Embedding gather (bf16) -> (Bp, L, Dp). Dropout == identity (eval).
    q_emb = jnp.take(en_tab, q_ids, axis=0)
    s_emb = jnp.take(src_tab, s_ids, axis=0)

    # Additive masks in f32 (exact 0 on valid positions).
    qmask = jnp.where(jnp.arange(LQ, dtype=jnp.int32)[None, :] < q_lens[:, None],
                      jnp.float32(0.0), jnp.float32(1e30))
    smask = jnp.where(jnp.arange(LS, dtype=jnp.int32)[None, :] < s_lens[:, None],
                      jnp.float32(0.0), jnp.float32(-1e30))

    out = _relevance_pallas(q_emb, s_emb, qmask, smask, tb)   # (Bp, 1)
    return out[:B]                                            # (B, 1)


# --------------------------------------------------------------------------
# Module wrapper (matches NN_architecture default word/word config)
# --------------------------------------------------------------------------
class NNArchitecturePallas:
    def __init__(self, en_embedding_matrix, src_embedding_matrix,
                 en_pad_word_id=0, src_pad_word_id=0):
        en = np.asarray(en_embedding_matrix, np.float32)
        src = np.asarray(src_embedding_matrix, np.float32)
        D = en.shape[1]
        assert src.shape[1] == D
        # Zero-pad the embedding dim to a lane-dense multiple of 128 once at
        # init; padded columns contribute exactly 0 to every dot product.
        Dp = _round_up(D, 128)
        en_p = np.zeros((en.shape[0], Dp), np.float32)
        src_p = np.zeros((src.shape[0], Dp), np.float32)
        en_p[:, :D] = en
        src_p[:, :D] = src
        # Store as bf16: the kernel is HBM-bandwidth bound; MXU takes bf16
        # natively and accumulates in f32.
        self.en_embed = jnp.asarray(en_p, jnp.bfloat16)
        self.src_embed = jnp.asarray(src_p, jnp.bfloat16)
        self.en_pad_word_id = int(en_pad_word_id)
        self.src_pad_word_id = int(src_pad_word_id)

    def forward(self, X, mode="train"):
        assert mode in ("train", "test")
        B = len(X)
        q_lens = np.array([len(x["query"]) for x in X], np.int32)
        s_lens = np.array([len(x["src"]) for x in X], np.int32)

        # Bucketed max lengths -> stable shapes (no recompiles), lane-aligned
        # LS so the axis=-1 max is an unmasked reduce.
        LQ = _round_up(max(1, int(q_lens.max())), 8)
        LS = _round_up(max(1, int(s_lens.max())), 128)

        # pad_sequence equivalent, built batch-major directly.
        q_ids = np.full((B, LQ), self.en_pad_word_id, np.int32)
        s_ids = np.full((B, LS), self.src_pad_word_id, np.int32)
        for i, x in enumerate(X):
            q_ids[i, :q_lens[i]] = np.asarray(x["query"], np.int32)
            s_ids[i, :s_lens[i]] = np.asarray(x["src"], np.int32)

        out = _relevance_from_ids(self.en_embed, self.src_embed,
                                  jnp.asarray(q_ids), jnp.asarray(s_ids),
                                  jnp.asarray(q_lens), jnp.asarray(s_lens))
        if mode == "test":
            return np.asarray(out[:, 0])   # numpy sigmoid scores, like torch test branch
        return out                         # (B, 1), like torch.sigmoid(stacked mins)


# --------------------------------------------------------------------------
# demo + self-check
# --------------------------------------------------------------------------
if __name__ == "__main__":
    key = jax.random.PRNGKey(0)
    k_en, k_src = jax.random.split(key)

    vocab_en, vocab_src, D = 50, 60, 32
    en_embedding_matrix = np.asarray(
        jax.random.normal(k_en, (vocab_en, D), jnp.float32) * 0.1)
    src_embedding_matrix = np.asarray(
        jax.random.normal(k_src, (vocab_src, D), jnp.float32) * 0.1)

    model = NNArchitecturePallas(en_embedding_matrix, src_embedding_matrix)

    # small, deterministic ragged batch (ids >= 1 so pad id 0 is never real)
    B = 2
    q_lengths = [8, 5]
    s_lengths = [16, 10]
    rng = np.random.RandomState(0)
    X = [
        {
            "query": rng.randint(1, vocab_en, size=(q_lengths[b],)).astype(np.int32),
            "src": rng.randint(1, vocab_src, size=(s_lengths[b],)).astype(np.int32),
        }
        for b in range(B)
    ]

    out = model.forward(X, mode="train")
    out = jax.block_until_ready(out)
    assert out.shape == (B, 1)

    # Reference of the PyTorch train branch, computed on the host in f32 using
    # the same bf16-rounded (and zero-D-padded) embedding tables the kernel sees.
    en_tab = np.asarray(model.en_embed, np.float32)
    src_tab = np.asarray(model.src_embed, np.float32)
    ref = []
    for b in range(B):
        qe = en_tab[np.asarray(X[b]["query"])]
        se = src_tab[np.asarray(X[b]["src"])]
        sc = qe @ se.T
        ref.append(1.0 / (1.0 + np.exp(-np.min(np.max(sc, axis=1)))))
    ref = np.asarray(ref, np.float32)[:, None]

    np.testing.assert_allclose(np.asarray(out), ref, rtol=1e-4, atol=1e-5)
    print("KERNEL_OK")
</pallas_src>

<mosaic_0001>
module attributes {stable_mosaic.version = 11 : i64} {
  func.func @_relevance_kernel(%arg0: i32, %arg1: memref<8x8x128xbf16, #tpu.memory_space<vmem>>, %arg2: memref<8x128x128xbf16, #tpu.memory_space<vmem>>, %arg3: memref<8x8xf32, #tpu.memory_space<vmem>>, %arg4: memref<8x128xf32, #tpu.memory_space<vmem>>, %arg5: memref<8x1xf32, #tpu.memory_space<vmem>>) attributes {dimension_semantics = [#tpu.dimension_semantics<parallel>], iteration_bounds = array<i64: 1>, scalar_prefetch = 0 : i64, scratch_operands = 0 : i64, tpu.core_type = #tpu.core_type<tc>, window_params = [{transform_indices = @transform_0, window_bounds = array<i64: 8, 8, 128>}, {transform_indices = @transform_1, window_bounds = array<i64: 8, 128, 128>}, {transform_indices = @transform_2, window_bounds = array<i64: 8, 8>}, {transform_indices = @transform_3, window_bounds = array<i64: 8, 128>}, {transform_indices = @transform_4, window_bounds = array<i64: 8, 1>}]} {
    %c0 = arith.constant 0 : index
    %c0_0 = arith.constant 0 : index
    %c0_1 = arith.constant 0 : index
    %0 = vector.load %arg1[%c0, %c0_0, %c0_1] : memref<8x8x128xbf16, #tpu.memory_space<vmem>>, vector<8x8x128xbf16>
    %c0_2 = arith.constant 0 : index
    %c0_3 = arith.constant 0 : index
    %c0_4 = arith.constant 0 : index
    %1 = vector.load %arg2[%c0_2, %c0_3, %c0_4] : memref<8x128x128xbf16, #tpu.memory_space<vmem>>, vector<8x128x128xbf16>
    "tpu.trace_start"() <{level = 10 : i32, message = "bqd,bkd->bqk"}> : () -> ()
    %cst = arith.constant dense<0.000000e+00> : vector<8x8x128xf32>
    %2 = tpu.matmul %0, %1, %cst {dimension_numbers = #tpu.dot_dimension_numbers<[2], [2], [1], [1], [0, 0, 0, 1, 1, 1], [0], [0]>} : vector<8x8x128xbf16>, vector<8x128x128xbf16>, vector<8x8x128xf32> -> vector<8x8x128xf32>
    "tpu.trace_stop"() : () -> ()
    %c0_5 = arith.constant 0 : index
    %c0_6 = arith.constant 0 : index
    %3 = vector.load %arg4[%c0_5, %c0_6] : memref<8x128xf32, #tpu.memory_space<vmem>>, vector<8x128xf32>
    %4 = vector.shape_cast %3 : vector<8x128xf32> to vector<8x1x128xf32>
    %5 = vector.broadcast %4 : vector<8x1x128xf32> to vector<8x8x128xf32>
    %6 = arith.addf %2, %5 : vector<8x8x128xf32>
    %cst_7 = arith.constant dense<0xFF800000> : vector<8x8xf32>
    %7 = vector.multi_reduction <maximumf>, %6, %cst_7 [2] : vector<8x8x128xf32> to vector<8x8xf32>
    %c0_8 = arith.constant 0 : index
    %c0_9 = arith.constant 0 : index
    %8 = vector.load %arg3[%c0_8, %c0_9] : memref<8x8xf32, #tpu.memory_space<vmem>>, vector<8x8xf32>
    %9 = arith.addf %7, %8 : vector<8x8xf32>
    %cst_10 = arith.constant dense<0x7F800000> : vector<8xf32>
    %10 = vector.multi_reduction <minimumf>, %9, %cst_10 [1] : vector<8x8xf32> to vector<8xf32>
    %11 = vector.shape_cast %10 : vector<8xf32> to vector<8x1xf32>
    %cst_11 = arith.constant 0.000000e+00 : f32
    %12 = vector.broadcast %cst_11 : f32 to vector<8x1xf32>
    %13 = arith.subf %12, %11 : vector<8x1xf32>
    %14 = math.exp %13 : vector<8x1xf32>
    %cst_12 = arith.constant 1.000000e+00 : f32
    %15 = vector.broadcast %cst_12 : f32 to vector<8x1xf32>
    %16 = arith.addf %15, %14 : vector<8x1xf32>
    %cst_13 = arith.constant 1.000000e+00 : f32
    %17 = vector.broadcast %cst_13 : f32 to vector<8x1xf32>
    %18 = arith.divf %17, %16 : vector<8x1xf32>
    %c0_14 = arith.constant 0 : index
    %c0_15 = arith.constant 0 : index
    %19 = vector.load %arg5[%c0_14, %c0_15] : memref<8x1xf32, #tpu.memory_space<vmem>>, vector<8x1xf32>
    tpu.vector_store %arg5[%c0_14, %c0_15], %18 {strides = array<i32>} : memref<8x1xf32, #tpu.memory_space<vmem>>, vector<8x1xf32>,
    return
  }
  func.func @transform_0(%arg0: i32) -> (i32, i32, i32) {
    %c0_i32 = arith.constant 0 : i32
    %c0_i32_0 = arith.constant 0 : i32
    %c0_i32_1 = arith.constant 0 : i32
    return %arg0, %c0_i32, %c0_i32_0 : i32, i32, i32
  }
  func.func @transform_1(%arg0: i32) -> (i32, i32, i32) {
    %c0_i32 = arith.constant 0 : i32
    %c0_i32_0 = arith.constant 0 : i32
    %c0_i32_1 = arith.constant 0 : i32
    return %arg0, %c0_i32, %c0_i32_0 : i32, i32, i32
  }
  func.func @transform_2(%arg0: i32) -> (i32, i32) {
    %c0_i32 = arith.constant 0 : i32
    %c0_i32_0 = arith.constant 0 : i32
    return %arg0, %c0_i32 : i32, i32
  }
  func.func @transform_3(%arg0: i32) -> (i32, i32) {
    %c0_i32 = arith.constant 0 : i32
    %c0_i32_0 = arith.constant 0 : i32
    return %arg0, %c0_i32 : i32, i32
  }
  func.func @transform_4(%arg0: i32) -> (i32, i32) {
    %c0_i32 = arith.constant 0 : i32
    %c0_i32_0 = arith.constant 0 : i32
    return %arg0, %c0_i32 : i32, i32
  }
}

</mosaic_0001>

<bundles_post_ra>
// kernel: _relevance_from_ids.1
= control target key start
LH: loop header
LB: loop body
LE: loop exit
PB: predicated region body
PF: predicated region fallthrough
CT: control target
= control target key end

     0   :  { %v685_v52 = vlaneseq  ;;  %vm798_vm0 = vcmask 1041409   ;;  %vm800_vm1 = vcmask 1042434   ;;  %vm802_vm2 = vcmask 1043459   ;;  %s1426_s1 = inlined_call_operand.vmem [shape: bf16[8,128,128], index: 1, kind: input, shape index: {}]   ;;  %s1427_s0 = inlined_call_operand.vmem [shape: bf16[8,8,128], index: 0, kind: input, shape index: {}]   ;;  %s1428_s2 = inlined_call_operand.vmem [shape: f32[8,8], index: 2, kind: input, shape index: {}]   ;;  %s1429_s3 = inlined_call_operand.vmem [shape: f32[8,128], index: 3, kind: input, shape index: {}]   ;;  %s1430_s4 = inlined_call_operand.vmem [shape: f32[8,1], index: 4, kind: output, shape index: {}]  }
   0x1   :  { %v1105_v0 = vld [vmem:[%s1426_s1 + $0x38] sm:$0xff]  ;;  %v1104_v4 = vld [vmem:[%s1426_s1 + $0x30] sm:$0xff]  ;;  %v1103_v8 = vld [vmem:[%s1426_s1 + $0x28] sm:$0xff]  ;;  %vm804_vm3 = vcmask 1044484   ;;  %vm806_vm4 = vcmask 1045509   ;;  %vm808_vm5 = vcmask 1046534  }
   0x2   :  { %v1113_v1 = vld [vmem:[%s1426_s1 + $0x78] sm:$0xff]  ;;  %226 = vmatpush.bf16.xpose.msra.mxu0 %v1105_v0  ;;  %v1112_v5 = vld [vmem:[%s1426_s1 + $0x70] sm:$0xff]  ;;  %v1111_v9 = vld [vmem:[%s1426_s1 + $0x68] sm:$0xff]  ;;  %v686_v53 = vshrl.u32 %v685_v52, 7  ;;  %vm810_vm6 = vcmask 1047559   ;;  %vm813_vm7 = vcmask 64512  }
   0x3   :  { %v1121_v2 = vld [vmem:[%s1426_s1 + $0xb8] sm:$0xff]  ;;  %287 = vmatpush.bf16.xpose.msra.mxu1 %v1113_v1  ;;  %v1120_v6 = vld [vmem:[%s1426_s1 + $0xb0] sm:$0xff]  ;;  %v1119_v10 = vld [vmem:[%s1426_s1 + $0xa8] sm:$0xff]  ;;  %vm836_vm10 = vcmask 7168  }
   0x4   :  { %v1129_v3 = vld [vmem:[%s1426_s1 + $0xf8] sm:$0xff]  ;;  %348 = vmatpush.bf16.xpose.msra.mxu2 %v1121_v2  ;;  %v1128_v7 = vld [vmem:[%s1426_s1 + $0xf0] sm:$0xff]  ;;  %v1127_v11 = vld [vmem:[%s1426_s1 + $0xe8] sm:$0xff]  ;;  %1164 = vset.pattern.permute.xlu2 %v686_v53 }
   0x5   :  { %409 = vmatpush.bf16.xpose.msra.mxu3 %v1129_v3  ;;  %v1102_v12 = vld [vmem:[%s1426_s1 + $0x20] sm:$0xff]  ;;  %v1101_v16 = vld [vmem:[%s1426_s1 + $0x18] sm:$0xff]  ;;  %v1100_v20 = vld [vmem:[%s1426_s1 + $0x10] sm:$0xff]  ;;  %1165 = vset.pattern.permute.xlu0 %v686_v53 }
   0x6   :  { %v1110_v13 = vld [vmem:[%s1426_s1 + $0x60] sm:$0xff]  ;;  %v1109_v17 = vld [vmem:[%s1426_s1 + $0x58] sm:$0xff]  ;;  %v1108_v21 = vld [vmem:[%s1426_s1 + $0x50] sm:$0xff]  ;;  %1163 = vset.pattern.permute.xlu1 %v686_v53 }
   0x7   :  { %v1118_v14 = vld [vmem:[%s1426_s1 + $0xa0] sm:$0xff]  ;;  %v1117_v18 = vld [vmem:[%s1426_s1 + $0x98] sm:$0xff]  ;;  %v1116_v22 = vld [vmem:[%s1426_s1 + $0x90] sm:$0xff] }
   0x8   :  { %v1126_v15 = vld [vmem:[%s1426_s1 + $0xe0] sm:$0xff]  ;;  %v1125_v19 = vld [vmem:[%s1426_s1 + $0xd8] sm:$0xff]  ;;  %v1124_v23 = vld [vmem:[%s1426_s1 + $0xd0] sm:$0xff] }
   0x9   :  { %v1099_v24 = vld [vmem:[%s1426_s1 + $0x8] sm:$0xff]  ;;  %v1098_v28 = vld [vmem:[%s1426_s1] sm:$0xff]  ;;  %v1137_v32 = vld [vmem:[%s1426_s1 + $0x138] sm:$0xff] }
   0xa   :  { %227 = vmatpush.bf16.xpose.msra.mxu0 %v1104_v4  ;;  %v1107_v25 = vld [vmem:[%s1426_s1 + $0x48] sm:$0xff]  ;;  %v1106_v29 = vld [vmem:[%s1426_s1 + $0x40] sm:$0xff]  ;;  %v1145_v33 = vld [vmem:[%s1426_s1 + $0x178] sm:$0xff] }
   0xb   :  { %288 = vmatpush.bf16.xpose.msra.mxu1 %v1112_v5  ;;  %v1115_v26 = vld [vmem:[%s1426_s1 + $0x88] sm:$0xff]  ;;  %v1114_v30 = vld [vmem:[%s1426_s1 + $0x80] sm:$0xff]  ;;  %v1153_v34 = vld [vmem:[%s1426_s1 + $0x1b8] sm:$0xff] }
   0xc   :  { %349 = vmatpush.bf16.xpose.msra.mxu2 %v1120_v6  ;;  %v1123_v27 = vld [vmem:[%s1426_s1 + $0xc8] sm:$0xff]  ;;  %v1122_v31 = vld [vmem:[%s1426_s1 + $0xc0] sm:$0xff]  ;;  %v1161_v35 = vld [vmem:[%s1426_s1 + $0x1f8] sm:$0xff] }
   0xd   :  { %410 = vmatpush.bf16.xpose.msra.mxu3 %v1128_v7  ;;  %v17_v36 = vld [vmem:[%s1427_s0] sm:$0xf]  ;;  %v18_v37 = vld [vmem:[%s1427_s0 + $0x4] sm:$0xf]  ;;  %v20_v38 = vld [vmem:[%s1427_s0 + $0xc] sm:$0xf] }
   0xe   :  { %v19_v39 = vld [vmem:[%s1427_s0 + $0x8] sm:$0xf]  ;;  %v1136_v40 = vld [vmem:[%s1426_s1 + $0x130] sm:$0xff]  ;;  %v1134_v48 = vld [vmem:[%s1426_s1 + $0x120] sm:$0xff] }
   0xf   :  { %v1144_v41 = vld [vmem:[%s1426_s1 + $0x170] sm:$0xff]  ;;  %v1135_v44 = vld [vmem:[%s1426_s1 + $0x128] sm:$0xff]  ;;  %v1142_v49 = vld [vmem:[%s1426_s1 + $0x160] sm:$0xff] }
  0x10   :  { %v1152_v42 = vld [vmem:[%s1426_s1 + $0x1b0] sm:$0xff]  ;;  %v1143_v45 = vld [vmem:[%s1426_s1 + $0x168] sm:$0xff]  ;;  %v1150_v50 = vld [vmem:[%s1426_s1 + $0x1a0] sm:$0xff] }
  0x11   :  { %v1160_v43 = vld [vmem:[%s1426_s1 + $0x1f0] sm:$0xff]  ;;  %v1151_v46 = vld [vmem:[%s1426_s1 + $0x1a8] sm:$0xff]  ;;  %v1158_v51 = vld [vmem:[%s1426_s1 + $0x1e0] sm:$0xff] }
  0x12   :  { %228 = vmatpush.bf16.xpose.msra.mxu0 %v1103_v8  ;;  %v1159_v47 = vld [vmem:[%s1426_s1 + $0x1e8] sm:$0xff]  ;;  %v1133_v54 = vld [vmem:[%s1426_s1 + $0x118] sm:$0xff]  ;;  %v682_v58 = vld [vmem:[%s1428_s2] sm:$0xff] }
  0x13   :  { %289 = vmatpush.bf16.xpose.msra.mxu1 %v1111_v9  ;;  %v1141_v55 = vld [vmem:[%s1426_s1 + $0x158] sm:$0xff]  ;;  %v691_v59 = vperm.slane %v682_v58, 1  ;;  %v698_v60 = vperm.slane %v682_v58, 2  ;;  %v684_v61 = vperm.slane %v682_v58, 0  ;;  %v1132_v62 = vld [vmem:[%s1426_s1 + $0x110] sm:$0xff]  ;;  %v705_v2 = vperm.slane %v682_v58, 3 }
  0x14   :  { %350 = vmatpush.bf16.xpose.msra.mxu2 %v1119_v10  ;;  %v1149_v56 = vld [vmem:[%s1426_s1 + $0x198] sm:$0xff]  ;;  %v1140_v63 = vld [vmem:[%s1426_s1 + $0x150] sm:$0xff]  ;;  %v733_v3 = vperm.slane %v682_v58, 7  ;;  %v1131_v4 = vld [vmem:[%s1426_s1 + $0x108] sm:$0xff]  ;;  %v712_v8 = vperm.slane %v682_v58, 4 }
  0x15   :  { %411 = vmatpush.bf16.xpose.msra.mxu3 %v1127_v11  ;;  %v1157_v57 = vld [vmem:[%s1426_s1 + $0x1d8] sm:$0xff]  ;;  %696 = vperm.xlu2 %1164, %v691_v59   ;;  %v1148_v0 = vld [vmem:[%s1426_s1 + $0x190] sm:$0xff]  ;;  %v1139_v5 = vld [vmem:[%s1426_s1 + $0x148] sm:$0xff] }
  0x16   :  { %703 = vperm.xlu0 %1165, %v698_v60   ;;  %v1156_v1 = vld [vmem:[%s1426_s1 + $0x1d0] sm:$0xff]  ;;  %689 = vperm.xlu1 %1163, %v684_v61   ;;  %v1147_v6 = vld [vmem:[%s1426_s1 + $0x188] sm:$0xff]  ;;  %v1130_v9 = vld [vmem:[%s1426_s1 + $0x100] sm:$0xff]  ;;  %v1173_v61 = vmov 0  }
  0x17   :  { %v1155_v7 = vld [vmem:[%s1426_s1 + $0x1c8] sm:$0xff]  ;;  %v1138_v10 = vld [vmem:[%s1426_s1 + $0x140] sm:$0xff] }
  0x18   :  { %v1146_v11 = vld [vmem:[%s1426_s1 + $0x180] sm:$0xff] }
  0x1a   :  { %229 = vmatpush.bf16.xpose.msra.mxu0 %v1102_v12  ;;  %v1154_v12 = vld [vmem:[%s1426_s1 + $0x1c0] sm:$0xff] }
  0x1b   :  { %290 = vmatpush.bf16.xpose.msra.mxu1 %v1110_v13  ;;  %v719_v13 = vperm.slane %v682_v58, 5 }
  0x1c   :  { %351 = vmatpush.bf16.xpose.msra.mxu2 %v1118_v14  ;;  %v21_v14 = vld [vmem:[%s1427_s0 + $0x10] sm:$0xf] }
  0x1d   :  { %412 = vmatpush.bf16.xpose.msra.mxu3 %v1126_v15  ;;  %710 = vperm.xlu2 %1164, %v705_v2   ;;  %v22_v15 = vld [vmem:[%s1427_s0 + $0x14] sm:$0xf] }
  0x1e   :  { %738 = vperm.xlu1 %1163, %v733_v3   ;;  %1167 = vset.pattern.permute.xlu0 %v1173_v61 }
  0x22   :  { %230 = vmatpush.bf16.xpose.msra.mxu0 %v1101_v16  ;;  %v23_v16 = vld [vmem:[%s1427_s0 + $0x18] sm:$0xf] }
  0x23   :  { %291 = vmatpush.bf16.xpose.msra.mxu1 %v1109_v17  ;;  %v24_v17 = vld [vmem:[%s1427_s0 + $0x1c] sm:$0xf] }
  0x24   :  { %352 = vmatpush.bf16.xpose.msra.mxu2 %v1117_v18  ;;  %v726_v18 = vperm.slane %v682_v58, 6 }
  0x25   :  { %413 = vmatpush.bf16.xpose.msra.mxu3 %v1125_v19  ;;  %717 = vperm.xlu2 %1164, %v712_v8   ;;  %v153_v19 = vld [vmem:[%s1429_s3] sm:$0xff] }
  0x26   :  { %1168 = vset.pattern.permute.xlu1 %v1173_v61 }
  0x2a   :  { %231 = vmatpush.bf16.xpose.msra.mxu0 %v1100_v20  ;;  %v162_v20 = vperm.slane %v153_v19, 0 }
  0x2b   :  { %292 = vmatpush.bf16.xpose.msra.mxu1 %v1108_v21  ;;  %v155_v21 = vrot.slane %v153_v19, 1 }
  0x2c   :  { %353 = vmatpush.bf16.xpose.msra.mxu2 %v1116_v22 }
  0x2d   :  { %414 = vmatpush.bf16.xpose.msra.mxu3 %v1124_v23  ;;  %724 = vperm.xlu2 %1164, %v719_v13   ;;  %v157_v23 = vrot.slane %v153_v19, 3 }
  0x32   :  { %232 = vmatpush.bf16.xpose.msra.mxu0 %v1099_v24 }
  0x33   :  { %293 = vmatpush.bf16.xpose.msra.mxu1 %v1107_v25  ;;  %v156_v25 = vrot.slane %v153_v19, 2 }
  0x34   :  { %354 = vmatpush.bf16.xpose.msra.mxu2 %v1115_v26 }
  0x35   :  { %415 = vmatpush.bf16.xpose.msra.mxu3 %v1123_v27  ;;  %731 = vperm.xlu2 %1164, %v726_v18   ;;  %v163_v27 = vperm.slane %v155_v21, 0 }
  0x3a   :  { %233 = vmatpush.bf16.xpose.msra.mxu0 %v1098_v28  ;;  %v165_v28 = vperm.slane %v157_v23, 0 }
  0x3b   :  { %294 = vmatpush.bf16.xpose.msra.mxu1 %v1106_v29  ;;  %v164_v29 = vperm.slane %v156_v25, 0  ;;  %v789_v25 = vand.u32 127, %v685_v52 }
  0x3c   :  { %355 = vmatpush.bf16.xpose.msra.mxu2 %v1114_v30 }
  0x3d   :  { %416 = vmatpush.bf16.xpose.msra.mxu3 %v1122_v31  ;;  %1166 = vset.pattern.permute.xlu2 %v1173_v61 }
  0x41   :  { %234 = vmatmul.bf16.vlgmr.msra.gmra.mxu0 %v17_v36 }
  0x42   :  { %470 = vmatpush.bf16.xpose.msrb.mxu0 %v1137_v32  ;;  %295 = vmatmul.bf16.vlgmr.msra.gmra.mxu1 %v18_v37 }
  0x43   :  { %531 = vmatpush.bf16.xpose.msrb.mxu1 %v1145_v33  ;;  %356 = vmatmul.bf16.vlgmr.msra.gmra.mxu2 %v19_v39  ;;  %v158_v39 = vrot.slane %v153_v19, 4 }
  0x44   :  { %592 = vmatpush.bf16.xpose.msrb.mxu2 %v1153_v34  ;;  %417 = vmatmul.bf16.vlgmr.msra.gmra.mxu3 %v20_v38 }
  0x45   :  { %653 = vmatpush.bf16.xpose.msrb.mxu3 %v1161_v35 }
  0x4a   :  { %471 = vmatpush.bf16.xpose.msrb.mxu0 %v1136_v40  ;;  %v159_v40 = vrot.slane %v153_v19, 5 }
  0x4b   :  { %532 = vmatpush.bf16.xpose.msrb.mxu1 %v1144_v41  ;;  %v166_v41 = vperm.slane %v158_v39, 0 }
  0x4c   :  { %593 = vmatpush.bf16.xpose.msrb.mxu2 %v1152_v42  ;;  %v167_v42 = vperm.slane %v159_v40, 0 }
  0x4d   :  { %654 = vmatpush.bf16.xpose.msrb.mxu3 %v1160_v43 }
  0x52   :  { %472 = vmatpush.bf16.xpose.msrb.mxu0 %v1135_v44 }
  0x53   :  { %533 = vmatpush.bf16.xpose.msrb.mxu1 %v1143_v45  ;;  %v160_v45 = vrot.slane %v153_v19, 6 }
  0x54   :  { %594 = vmatpush.bf16.xpose.msrb.mxu2 %v1151_v46 }
  0x55   :  { %655 = vmatpush.bf16.xpose.msrb.mxu3 %v1159_v47 }
  0x5a   :  { %473 = vmatpush.bf16.xpose.msrb.mxu0 %v1134_v48  ;;  %v168_v48 = vperm.slane %v160_v45, 0 }
  0x5b   :  { %534 = vmatpush.bf16.xpose.msrb.mxu1 %v1142_v49 }
  0x5c   :  { %595 = vmatpush.bf16.xpose.msrb.mxu2 %v1150_v50  ;;  %v161_v50 = vrot.slane %v153_v19, 7 }
  0x5d   :  { %656 = vmatpush.bf16.xpose.msrb.mxu3 %v1158_v51 }
  0x62   :  { %474 = vmatpush.bf16.xpose.msrb.mxu0 %v1133_v54 }
  0x63   :  { %535 = vmatpush.bf16.xpose.msrb.mxu1 %v1141_v55 }
  0x64   :  { %596 = vmatpush.bf16.xpose.msrb.mxu2 %v1149_v56  ;;  %v169_v56 = vperm.slane %v161_v50, 0 }
  0x65   :  { %657 = vmatpush.bf16.xpose.msrb.mxu3 %v1157_v57 }
  0x6a   :  { %475 = vmatpush.bf16.xpose.msrb.mxu0 %v1132_v62 }
  0x6b   :  { %536 = vmatpush.bf16.xpose.msrb.mxu1 %v1140_v63 }
  0x6c   :  { %597 = vmatpush.bf16.xpose.msrb.mxu2 %v1148_v0 }
  0x6d   :  { %658 = vmatpush.bf16.xpose.msrb.mxu3 %v1156_v1 }
  0x6f   :  { %v697_v60 = vpop.permute.xlu2 %696 }
  0x72   :  { %476 = vmatpush.bf16.xpose.msrb.mxu0 %v1131_v4 }
  0x73   :  { %537 = vmatpush.bf16.xpose.msrb.mxu1 %v1139_v5 }
  0x74   :  { %598 = vmatpush.bf16.xpose.msrb.mxu2 %v1147_v6 }
  0x75   :  { %659 = vmatpush.bf16.xpose.msrb.mxu3 %v1155_v7 }
  0x77   :  { %v711_v62 = vpop.permute.xlu2 %710 }
  0x7a   :  { %477 = vmatpush.bf16.xpose.msrb.mxu0 %v1130_v9 }
  0x7b   :  { %538 = vmatpush.bf16.xpose.msrb.mxu1 %v1138_v10 }
  0x7c   :  { %599 = vmatpush.bf16.xpose.msrb.mxu2 %v1146_v11 }
  0x7d   :  { %660 = vmatpush.bf16.xpose.msrb.mxu3 %v1154_v12 }
  0x7f   :  { %v718_v63 = vpop.permute.xlu2 %717 }
  0x81   :  { %478 = vmatmul.bf16.vlgmr.msrb.gmra.mxu0 %v21_v14 }
  0x82   :  { %539 = vmatmul.bf16.vlgmr.msrb.gmra.mxu1 %v22_v15 }
  0x83   :  { %600 = vmatmul.bf16.vlgmr.msrb.gmra.mxu2 %v23_v16 }
  0x84   :  { %661 = vmatmul.bf16.vlgmr.msrb.gmra.mxu3 %v24_v17 }
  0x87   :  { %v725_v2 = vpop.permute.xlu2 %724 }
  0x88   :  { %v690_v0 = vpop.permute.xlu1 %689  ;;  %v704_v1 = vpop.permute.xlu0 %703 }
  0x8f   :  { %v732_v6 = vpop.permute.xlu2 %731 }
  0x90   :  { %v739_v3 = vpop.permute.xlu1 %738 }
  0xbe   :  { %v235_v22 = vpop.f32.mrf.mxu0 }
  0xbf   :  { %v296_v24 = vpop.f32.mrf.mxu1  ;;  %v236_v26 = vadd.f32 %v235_v22, %v162_v20 }
  0xc0   :  { %v297_v31 = vadd.f32 %v296_v24, %v163_v27 }
  0xc1   :  { %666 = vmax.xlane.f32.xlu0 %v236_v26 }
  0xc6   :  { %v357_v32 = vpop.f32.mrf.mxu2  ;;  %v237_v35 = vpop.f32.mrf.mxu0 }
  0xc7   :  { %v418_v30 = vpop.f32.mrf.mxu3  ;;  %v358_v34 = vadd.f32 %v357_v32, %v164_v29  ;;  %v298_v36 = vpop.f32.mrf.mxu1 }
  0xc8   :  { %v419_v33 = vadd.f32 %v418_v30, %v165_v28 }
  0xc9   :  { %670 = vmax.xlane.f32.xlu1 %v358_v34  ;;  %668 = vmax.xlane.f32.xlu0 %v297_v31 }
  0xca   :  { %672 = vmax.xlane.f32.xlu2 %v419_v33 }
  0xce   :  { %v359_v37 = vpop.f32.mrf.mxu2 }
  0xcf   :  { %v420_v38 = vpop.f32.mrf.mxu3 }
  0xfe   :  { %v479_v43 = vpop.f32.mrf.mxu0 }
  0xff   :  { %v540_v44 = vpop.f32.mrf.mxu1  ;;  %v480_v46 = vadd.f32 %v479_v43, %v166_v41 }
 0x100   :  { %v541_v47 = vadd.f32 %v540_v44, %v167_v42 }
 0x101   :  { %674 = vmax.xlane.f32.xlu1 %v480_v46 }
 0x102   :  { %676 = vmax.xlane.f32.xlu0 %v541_v47 }
 0x106   :  { %v601_v49 = vpop.f32.mrf.mxu2  ;;  %v481_v54 = vpop.f32.mrf.mxu0 }
 0x107   :  { %v662_v51 = vpop.f32.mrf.mxu3  ;;  %v602_v53 = vadd.f32 %v601_v49, %v168_v48  ;;  %v542_v55 = vpop.f32.mrf.mxu1 }
 0x108   :  { %v663_v58 = vadd.f32 %v662_v51, %v169_v56 }
 0x109   :  { %678 = vmax.xlane.f32.xlu1 %v602_v53 }
 0x10e   :  { %v603_v57 = vpop.f32.mrf.mxu2 }
 0x10f   :  { %v664_v59 = vpop.f32.mrf.mxu3 }
 0x111   :  { %680 = vmax.xlane.f32.xlu1 %v663_v58 }
 0x134   :  { %v667_v4 = vpop.xlane.xlu0 %666 }
 0x135   :  { %v748_v5 = vadd.f32 %v690_v0, %v667_v4 }
 0x137   :  { %765 = vperm.xlu2 %1166, %v748_v5  }
 0x13c   :  { %v671_v7 = vpop.xlane.xlu1 %670  ;;  %v669_v9 = vpop.xlane.xlu0 %668 }
 0x13d   :  { %v750_v8 = vadd.f32 %v704_v1, %v671_v7  ;;  %v749_v10 = vadd.f32 %v697_v60, %v669_v9  ;;  %v673_v11 = vpop.xlane.xlu2 %672 }
 0x13e   :  { %v751_v12 = vadd.f32 %v711_v62, %v673_v11 }
 0x13f   :  { %771 = vperm.xlu2 %1166, %v750_v8   ;;  %768 = vperm.xlu0 %1167, %v749_v10  }
 0x147   :  { %774 = vperm.xlu2 %1166, %v751_v12  }
 0x174   :  { %v675_v13 = vpop.xlane.xlu1 %674 }
 0x175   :  { %v677_v14 = vpop.xlane.xlu0 %676  ;;  %v752_v15 = vadd.f32 %v718_v63, %v675_v13 }
 0x176   :  { %v753_v16 = vadd.f32 %v725_v2, %v677_v14 }
 0x177   :  { %777 = vperm.xlu1 %1168, %v752_v15  }
 0x178   :  { %780 = vperm.xlu2 %1166, %v753_v16  }
 0x17c   :  { %v679_v17 = vpop.xlane.xlu1 %678 }
 0x17d   :  { %v754_v18 = vadd.f32 %v732_v6, %v679_v17 }
 0x17f   :  { %783 = vperm.xlu1 %1168, %v754_v18  }
 0x184   :  { %v681_v19 = vpop.xlane.xlu1 %680 }
 0x185   :  { %v755_v20 = vadd.f32 %v739_v3, %v681_v19 }
 0x187   :  { %786 = vperm.xlu2 %1166, %v755_v20  }
 0x191   :  { %v766_v21 = vpop.permute.xlu2 %765 }
 0x192   :  { %v790_v27 = vperm.slane %v766_v21, %v789_v25 }
 0x199   :  { %v772_v22 = vpop.permute.xlu2 %771 }
 0x19a   :  { %v792_v31 = vperm.slane %v772_v22, %v789_v25 }
 0x1a1   :  { %v775_v23 = vpop.permute.xlu2 %774 }
 0x1a2   :  { %v793_v34 = vperm.slane %v775_v23, %v789_v25 }
 0x1b1   :  { %v769_v24 = vpop.permute.xlu0 %768 }
 0x1b2   :  { %v791_v26 = vperm.slane %v769_v24, %v789_v25 }
 0x1b4   :  { %v799_v29 = vsel %vm798_vm0, %v791_v26, %v790_v27 }
 0x1b5   :  { %v801_v32 = vsel %vm800_vm1, %v792_v31, %v799_v29 }
 0x1b6   :  { %v803_v35 = vsel %vm802_vm2, %v793_v34, %v801_v32 }
 0x1d2   :  { %v781_v28 = vpop.permute.xlu2 %780 }
 0x1d3   :  { %v795_v38 = vperm.slane %v781_v28, %v789_v25 }
 0x1e1   :  { %v787_v36 = vpop.permute.xlu2 %786 }
 0x1e2   :  { %v797_v40 = vperm.slane %v787_v36, %v789_v25 }
 0x1e9   :  { %v778_v30 = vpop.permute.xlu1 %777 }
 0x1ea   :  { %v794_v33 = vperm.slane %v778_v30, %v789_v25 }
 0x1ec   :  { %v805_v37 = vsel %vm804_vm3, %v794_v33, %v803_v35 }
 0x1ed   :  { %v807_v41 = vsel %vm806_vm4, %v795_v38, %v805_v37 }
 0x1f1   :  { %v784_v39 = vpop.permute.xlu1 %783 }
 0x1f2   :  { %v796_v52 = vperm.slane %v784_v39, %v789_v25 }
 0x1f4   :  { %v809_v42 = vsel %vm808_vm5, %v796_v52, %v807_v41 }
 0x1f5   :  { %v811_v43 = vsel %vm810_vm6, %v797_v40, %v809_v42 }
 0x1f6   :  { %v814_v44 = vsel %vm813_vm7, %v811_v43, inf }
 0x1f7   :  { %815 = vmin.xlane.f32.xlu1 %v814_v44 }
 0x26a   :  { %v816_v45 = vpop.xlane.xlu1 %815 }
 0x26b   :  { %v817_v46 = vsub.f32 0.0, %v816_v45 }
 0x26d   :  { %v818_v47 = vmul.f32 1.442695, %v817_v46 }
 0x26f   :  { %1169 = vpow2.f32 %v818_v47 }
 0x275   :  { %v1170_v48 = vpop.eup %1169 }
 0x276   :  { %v820_v49 = vadd.f32 1.0, %v1170_v48 }
 0x278   :  { %1171 = vrcp.f32 %v820_v49  ;;  %v832_v54 = vand.u32 2147483648, %v820_v49  ;;  %v830_v56 = vand.u32 2147483647, %v820_v49  ;;  %vm826_vm9 = vweird.f32 %v820_v49 }
 0x27a   :  { %v833_v58 = vor.u32 1.1754944e-38, %v832_v54  ;;  %vm831_vm12 = vcmp.eq.f32.partialorder %v830_v56, 8.507059e+37 }
 0x27e   :  { %v1172_v50 = vpop.eup %1171 }
 0x27f   :  { %v822_v51 = vmul.f32 %v1172_v50, %v820_v49  ;;  %vm827_vm8 = vweird.f32 %v1172_v50 }
 0x280   :  { %vm828_vm11 = vmor %vm826_vm9, %vm827_vm8 }
 0x281   :  { %v823_v53 = vsub.f32 1.0, %v822_v51 }
 0x283   :  { %v824_v55 = vmul.f32 %v1172_v50, %v823_v53 }
 0x285   :  { %v825_v57 = vadd.f32 %v1172_v50, %v824_v55 }
 0x287   :  { %v829_v59 = vsel %vm828_vm11, %v1172_v50, %v825_v57 }
 0x288   :  { %v834_v60 = vsel %vm831_vm12, %v833_v58, %v829_v59 }
 0x289   :  { %837 = vst.msk [vmem:[%s1430_s4] sm:$0xff] %vm836_vm10, %v834_v60 }

</bundles_post_ra>
